<compile_context>
chip_gen: v7x
topology: tpu7x:2x2x1
jax: 0.10.0
libtpu: 0.0.40
codegen_flags: <defaults>
</compile_context>

<pallas_src>
import jax
import jax.numpy as jnp
from jax.experimental import pallas as pl
from jax.experimental.pallas import tpu as pltpu


# ----------------------------- per-generation VMEM budget -----------------------------
def _vmem_limit_bytes():
    """75% of the physical per-core VMEM (v5e/v6e: 128 MiB, v7x: 64 MiB)."""
    cap = 64 * 1024 * 1024                      # conservative fallback = v7x physical
    try:
        info = pltpu.get_tpu_info()
        cap = int(getattr(info, "vmem_capacity_bytes", cap)) or cap
    except Exception:
        pass
    return (3 * cap) // 4


# ----------------------------- tile selection -----------------------------
def _choose_tile(n, max_tile):
    """Largest multiple-of-128 divisor of n that is <= max_tile, else the full axis."""
    t = (min(n, max_tile) // 128) * 128
    while t >= 128:
        if n % t == 0:
            return t
        t -= 128
    return n   # n < 128, or no multiple-of-128 divisor: full axis keeps the block legal


def _keep_megacore_busy(n, tile, batch, min_steps=2):
    """Keep >= min_steps parallel grid iterations so both v7x TensorCores get work."""
    while batch * (n // tile) < min_steps and tile % 256 == 0 and n % (tile // 2) == 0:
        tile //= 2
    return tile


def _pick_tile_a(n, batch):
    # Kernel A moves only ~(C_in + C_out + 2*mid) * tn bytes per step: make the tile big enough
    # that the ~0.35 us per-step pipeline overhead is amortised.
    return _keep_megacore_busy(n, _choose_tile(n, 2048), batch)


def _pick_tile_b(n, batch, c, mid, k, vmem_limit):
    # Size Kernel B's tile from a per-step VMEM estimate covering the K-expanded streams and the
    # (tn*K, mid) f32 intermediates; stay within half the scoped-VMEM limit (headroom for scratch).
    def est(tn):
        nk = tn * k
        blocks = (c * tn * 2            # x centres (bf16, channels-first)
                  + nk * 2 * mid * 2    # gathered k|v (bf16)
                  + 8 * nk * 4          # rel (f32, 3 rows padded to 8 sublanes)
                  + c * tn * 4)         # output (f32)
        interm = 6 * nk * mid * 4       # ~6 live (nk, mid) f32 intermediates (worst case)
        return 2 * blocks + interm      # x2: double-buffered pipeline
    tn = _choose_tile(n, 1024)
    budget = vmem_limit // 2
    while tn > 128 and est(tn) > budget:
        nxt = tn - 128
        while nxt >= 128 and n % nxt:
            nxt -= 128
        if nxt < 128:
            break
        tn = nxt
    return _keep_megacore_busy(n, tn, batch)


# ----------------------------- Kernel A: PointwiseConv1D + BN + ReLU (+ fused k|v) ----------------
def pwc_kernel(x_ref, w_ref, shift_ref, wkv_ref, bkv_ref, oh_ref, okv_ref):
    x = x_ref[0]                                              # (C_in, TN) f32
    c_in = x.shape[0]
    if c_in <= 8:
        # tiny contraction: VPU broadcast-FMA beats a (C_in/256)-utilised MXU matmul
        h = w_ref[:, 0:1] * x[0:1, :]
        for ci in range(1, c_in):
            h = h + w_ref[:, ci:ci + 1] * x[ci:ci + 1, :]
    else:
        h = jnp.dot(w_ref[...], x, preferred_element_type=jnp.float32)
    h = jnp.maximum(h + shift_ref[...], 0.0)                  # BatchNorm1d (eval) shift + ReLU
    oh_ref[0] = h.astype(oh_ref.dtype)                        # (C_out, TN): lane-dense store

    # fused k|v projection of every point ONCE (deduped out of the K-expanded neighbour loop)
    kv = jax.lax.dot_general(h.astype(jnp.bfloat16), wkv_ref[...],
                             (((0,), (0,)), ((), ())),
                             preferred_element_type=jnp.float32)   # (TN, 2*mid)
    okv_ref[0] = (kv + bkv_ref[...]).astype(okv_ref.dtype)


def pointwise_conv_bn_relu(x, fused, tn, vmem_limit):
    B, C_in, N = x.shape
    C_out = fused["w_pwc"].shape[0]
    two_mid = fused["wkv"].shape[1]
    return pl.pallas_call(
        pwc_kernel,
        out_shape=(jax.ShapeDtypeStruct((B, C_out, N), jnp.bfloat16),
                   jax.ShapeDtypeStruct((B, N, two_mid), jnp.bfloat16)),
        grid=(B, N // tn),
        in_specs=[
            pl.BlockSpec((1, C_in, tn), lambda b, n: (b, 0, n)),
            pl.BlockSpec(fused["w_pwc"].shape, lambda b, n: (0, 0)),
            pl.BlockSpec(fused["bn_shift"].shape, lambda b, n: (0, 0)),
            pl.BlockSpec(fused["wkv"].shape, lambda b, n: (0, 0)),
            pl.BlockSpec(fused["bkv"].shape, lambda b, n: (0, 0)),
        ],
        out_specs=(pl.BlockSpec((1, C_out, tn), lambda b, n: (b, 0, n)),
                   pl.BlockSpec((1, tn, two_mid), lambda b, n: (b, n, 0))),
        compiler_params=pltpu.CompilerParams(
            dimension_semantics=("parallel", "parallel"),
            vmem_limit_bytes=vmem_limit),
    )(x, fused["w_pwc"], fused["bn_shift"], fused["wkv"], fused["bkv"])


# ----------------------------- Kernel B: PointTransformerBlock -----------------------------
def pt_block_kernel(x_ref, kvn_ref, rel_ref,
                    wq_ref, wp1t_ref, wp2_ref, wa1_ref, wa2_ref, wl2_ref,
                    brow_ref, bp1c_ref, bl2c_ref, o_ref):
    # TODO(synk): torchpcp's PointTransformerBlock interleaves BatchNorm layers inside the
    # linear/pos/attn MLPs; this follows the canonical Point Transformer vector-attention math.
    x = x_ref[0]                        # (C, TN)      bf16 centre features, channels-first
    kvn = kvn_ref[0]                    # (TN*K, 2mid) bf16 gathered, already-projected k|v
    rel = rel_ref[0]                    # (3, TN*K)    f32 relative coords, coordinate-major
    c, tn = x.shape
    nk = kvn.shape[0]
    k = nk // tn
    mid = wq_ref.shape[1]

    bq = brow_ref[0:1, :]               # (1, mid) row-biases
    bp2 = brow_ref[1:2, :]
    ba1 = brow_ref[2:3, :]
    ba2 = brow_ref[3:4, :]

    # positional MLP layer 1 (3 -> mid) on the VPU, computed transposed so the lane axis stays
    # the long edge axis (no (.., 3)-wide operand anywhere)
    p_t = wp1t_ref[:, 0:1] * rel[0:1, :]                            # (mid, TN*K)
    for ci in range(1, rel.shape[0]):
        p_t = p_t + wp1t_ref[:, ci:ci + 1] * rel[ci:ci + 1, :]
    p_t = jnp.maximum(p_t + bp1c_ref[...], 0.0)
    # layer 2 on the MXU; contracting dim 0 drops the result straight into (edge, mid) layout
    p = jax.lax.dot_general(p_t.astype(jnp.bfloat16), wp2_ref[...],
                            (((0,), (0,)), ((), ())),
                            preferred_element_type=jnp.float32) + bp2   # (TN*K, mid)

    # consume k|v immediately so kf / v / p die before the attention MLP (working-set control)
    d = p - kvn[:, :mid].astype(jnp.float32)                        # -k_j + delta_ij
    vp = kvn[:, mid:].astype(jnp.float32) + p                       #  v_j + delta_ij

    # q for the centres (Linear-down folded into wq); x is channels-first -> contract dim 0
    q = jax.lax.dot_general(x, wq_ref[...], (((0,), (0,)), ((), ())),
                            preferred_element_type=jnp.float32) + bq    # (TN, mid)

    # attention MLP gamma(q_i - k_j + delta_ij): Linear -> ReLU -> Linear
    a = (d.reshape(tn, k, mid) + q[:, None, :]).reshape(nk, mid)
    a = jnp.dot(a.astype(jnp.bfloat16), wa1_ref[...],
                preferred_element_type=jnp.float32) + ba1
    a = jnp.maximum(a, 0.0)
    a = (jnp.dot(a.astype(jnp.bfloat16), wa2_ref[...],
                 preferred_element_type=jnp.float32) + ba2).reshape(tn, k, mid)

    # per-channel softmax over the K neighbours (vector attention); approx recip is inference-only
    a = jnp.exp(a - jnp.max(a, axis=1, keepdims=True))
    a = a * pl.reciprocal(jnp.sum(a, axis=1, keepdims=True), approx=True)

    # weighted aggregation of (values + positional encoding)
    agg = jnp.sum(a * vp.reshape(tn, k, mid), axis=1)               # (TN, mid)

    # up-projection computed channels-first (lane-dense store) + residual -> NCW output directly
    z = jax.lax.dot_general(wl2_ref[...], agg.astype(jnp.bfloat16),
                            (((0,), (1,)), ((), ())),
                            preferred_element_type=jnp.float32)     # (C, TN)
    o_ref[0] = (z + bl2c_ref[...] + x.astype(jnp.float32)).astype(o_ref.dtype)


def point_transformer_block_call(x_cf, kvn, rel, fused, tn, vmem_limit):
    B, C, N = x_cf.shape
    K = kvn.shape[1] // N
    two_mid = kvn.shape[2]
    coord = rel.shape[1]

    consts = [fused["wq"], fused["wp1_t"], fused["wp2"], fused["wa1"], fused["wa2"],
              fused["wl2"], fused["bias_rows"], fused["bp1_col"], fused["bl2_col"]]

    in_specs = [
        pl.BlockSpec((1, C, tn), lambda b, n: (b, 0, n)),
        pl.BlockSpec((1, tn * K, two_mid), lambda b, n: (b, n, 0)),
        pl.BlockSpec((1, coord, tn * K), lambda b, n: (b, 0, n)),
    ] + [pl.BlockSpec(w.shape, lambda b, n: (0, 0)) for w in consts]

    return pl.pallas_call(
        pt_block_kernel,
        out_shape=jax.ShapeDtypeStruct((B, C, N), jnp.float32),
        grid=(B, N // tn),
        in_specs=in_specs,
        out_specs=pl.BlockSpec((1, C, tn), lambda b, n: (b, 0, n)),
        compiler_params=pltpu.CompilerParams(
            dimension_semantics=("parallel", "parallel"),
            vmem_limit_bytes=vmem_limit),
    )(x_cf, kvn, rel, *consts)


# ----------------------------- offline parameter folding -----------------------------
def prepare_fused_params(params):
    f32, bf16 = jnp.float32, jnp.bfloat16

    # fold BN (eval) scale into the 1x1-conv weight; shift stays as a per-channel column
    w_pwc = (params["w_pwc"] * params["bn_scale"]).astype(f32)      # (C_out, C_in)
    bn_shift = params["bn_shift"].reshape(-1, 1).astype(f32)        # (C_out, 1)

    wl1, bl1 = params["wl1"], params["bl1"]                         # (C, mid), (1, mid)

    def fold(wB, bB):   # (x @ wl1 + bl1) @ wB + bB  ==  x @ (wl1 @ wB) + (bl1 @ wB + bB)
        return wl1 @ wB, (bl1 @ wB + bB)

    wq_f, bq_f = fold(params["wq"], params["bq"])                   # (C, mid), (1, mid)
    wk_f, bk_f = fold(params["wk"], params["bk"])
    wv_f, bv_f = fold(params["wv"], params["bv"])
    wkv_f = jnp.concatenate([wk_f, wv_f], axis=1)                   # (C, 2*mid)
    bkv_f = jnp.concatenate([bk_f, bv_f], axis=1)                   # (1, 2*mid)

    mid = wq_f.shape[1]
    bias_rows = jnp.zeros((8, mid), f32)                            # rows: bq | bp2 | ba1 | ba2
    bias_rows = bias_rows.at[0].set(bq_f.reshape(-1))
    bias_rows = bias_rows.at[1].set(params["bp2"].reshape(-1))
    bias_rows = bias_rows.at[2].set(params["ba1"].reshape(-1))
    bias_rows = bias_rows.at[3].set(params["ba2"].reshape(-1))

    return {
        "w_pwc": w_pwc, "bn_shift": bn_shift,
        "wkv": wkv_f.astype(bf16), "bkv": bkv_f.astype(f32),
        "wq": wq_f.astype(bf16),
        "wp1_t": params["wp1"].T.astype(f32),                       # (mid, 3): stays on the VPU
        "bp1_col": params["bp1"].reshape(-1, 1).astype(f32),        # (mid, 1)
        "wp2": params["wp2"].astype(bf16),
        "wa1": params["wa1"].astype(bf16), "wa2": params["wa2"].astype(bf16),
        "wl2": params["wl2"].astype(bf16),
        "bl2_col": params["bl2"].reshape(-1, 1).astype(f32),        # (C, 1)
        "bias_rows": bias_rows,
    }


# ----------------------------- JAX glue: kNN + gather of projected k|v -----------------------------
def knn_gather(p1, kv_all, k):
    # kNN over coordinates (XLA glue, O(N^2)) + gather of the *already projected* k|v features.
    # TODO(synk): for large N move this gather in-kernel (scalar-prefetched idx + DMA gather) and
    #             tile the distance/top-k computation.
    B, coord, N = p1.shape
    pt = jnp.transpose(p1, (0, 2, 1))                                        # (B, N, 3)
    d2 = jnp.sum((pt[:, :, None, :] - pt[:, None, :, :]) ** 2, axis=-1)      # (B, N, N)
    _, idx = jax.lax.top_k(-d2, k)                                           # (B, N, k), incl. self
    idx_flat = idx.reshape(B, N * k)
    kvn = jnp.take_along_axis(kv_all, idx_flat[:, :, None], axis=1)          # (B, N*k, 2*mid) bf16
    pn = jnp.take_along_axis(p1, idx_flat[:, None, :], axis=2)               # (B, 3, N*k)
    rel = jnp.repeat(p1, k, axis=2) - pn                                     # coordinate-major f32
    return kvn, rel


def mlppt_forward(x, p1, params, k):
    B, C_in, N = x.shape
    fused = prepare_fused_params(params)
    C_out, mid = fused["wq"].shape
    vmem_limit = _vmem_limit_bytes()
    tn_a = _pick_tile_a(N, B)
    tn_b = _pick_tile_b(N, B, C_out, mid, k, vmem_limit)
    h_cf, kv_all = pointwise_conv_bn_relu(x, fused, tn_a, vmem_limit)        # (B,C,N), (B,N,2mid)
    kvn, rel = knn_gather(p1, kv_all, k)
    y = point_transformer_block_call(h_cf, kvn, rel, fused, tn_b, vmem_limit)  # (B, C, N)
    return y, p1


# ----------------------------- pure-JAX reference (f32, unfused) -----------------------------
def mlppt_reference(x, p1, params, k):
    h = jnp.einsum('oc,bcn->bon', params["w_pwc"], x)
    h = h * params["bn_scale"][None] + params["bn_shift"][None]
    h = jnp.maximum(h, 0.0)
    h_nc = jnp.transpose(h, (0, 2, 1))                                       # (B, N, C)
    pt = jnp.transpose(p1, (0, 2, 1))
    d2 = jnp.sum((pt[:, :, None, :] - pt[:, None, :, :]) ** 2, axis=-1)
    _, idx = jax.lax.top_k(-d2, k)
    xn = jnp.take_along_axis(h_nc[:, None], idx[..., None], axis=2)          # (B, N, K, C)
    pn = jnp.take_along_axis(pt[:, None], idx[..., None], axis=2)
    rel = pt[:, :, None, :] - pn

    def lin(a, w, b):
        return a @ w + b

    y = lin(h_nc, params["wl1"], params["bl1"])
    yn = lin(xn, params["wl1"], params["bl1"])
    q = lin(y, params["wq"], params["bq"])
    kf = lin(yn, params["wk"], params["bk"])
    v = lin(yn, params["wv"], params["bv"])
    p = jnp.maximum(lin(rel, params["wp1"], params["bp1"]), 0.0)
    p = lin(p, params["wp2"], params["bp2"])
    a = lin(q[:, :, None, :] - kf + p, params["wa1"], params["ba1"])
    a = lin(jnp.maximum(a, 0.0), params["wa2"], params["ba2"])
    a = jax.nn.softmax(a, axis=2)
    agg = jnp.sum(a * (v + p), axis=2)
    z = lin(agg, params["wl2"], params["bl2"]) + h_nc
    return jnp.transpose(z, (0, 2, 1)), p1


# ----------------------------- deterministic parameter init -----------------------------
def init_params(key, c_in, c_out, mid, coord):
    keys = jax.random.split(key, 19)

    def w(kk, shape, scale=0.1):
        return scale * jax.random.normal(kk, shape, dtype=jnp.float32)

    p = {}
    p["w_pwc"] = w(keys[0], (c_out, c_in))
    # BatchNorm1d eval mode, PyTorch defaults: gamma=1, beta=0, running_mean=0, running_var=1
    eps = 1e-5
    gamma = jnp.ones((c_out,), jnp.float32)
    beta = jnp.zeros((c_out,), jnp.float32)
    rmean = jnp.zeros((c_out,), jnp.float32)
    rvar = jnp.ones((c_out,), jnp.float32)
    scale = gamma / jnp.sqrt(rvar + eps)
    p["bn_scale"] = scale.reshape(c_out, 1)
    p["bn_shift"] = (beta - rmean * scale).reshape(c_out, 1)

    p["wl1"] = w(keys[1], (c_out, mid));  p["bl1"] = w(keys[2], (1, mid))
    p["wq"] = w(keys[3], (mid, mid));     p["bq"] = w(keys[4], (1, mid))
    p["wk"] = w(keys[5], (mid, mid));     p["bk"] = w(keys[6], (1, mid))
    p["wv"] = w(keys[7], (mid, mid));     p["bv"] = w(keys[8], (1, mid))
    p["wp1"] = w(keys[9], (coord, mid));  p["bp1"] = w(keys[10], (1, mid))
    p["wp2"] = w(keys[11], (mid, mid));   p["bp2"] = w(keys[12], (1, mid))
    p["wa1"] = w(keys[13], (mid, mid));   p["ba1"] = w(keys[14], (1, mid))
    p["wa2"] = w(keys[15], (mid, mid));   p["ba2"] = w(keys[16], (1, mid))
    p["wl2"] = w(keys[17], (mid, c_out)); p["bl2"] = w(keys[18], (1, c_out))
    return p


if __name__ == "__main__":
    B, N = 2, 16
    C_in, C_out, MID, COORD, K = 4, 32, 8, 3, 4

    key = jax.random.PRNGKey(0)
    kx, kp, kparam = jax.random.split(key, 3)
    x = jax.random.normal(kx, (B, C_in, N), dtype=jnp.float32)    # (B, C_in, N) NCW
    p1 = jax.random.normal(kp, (B, COORD, N), dtype=jnp.float32)  # (B, 3, N)

    params = init_params(kparam, C_in, C_out, MID, COORD)

    y, p_out = mlppt_forward(x, p1, params, K)
    jax.block_until_ready((y, p_out))

    assert y.shape == (B, C_out, N)
    assert p_out.shape == p1.shape
    assert jnp.all(jnp.isfinite(y))

    # numerics check against the f32/unfused reference (tolerance covers bf16 MXU + approx recip)
    y_ref, _ = mlppt_reference(x, p1, params, K)
    err = float(jnp.max(jnp.abs(y - y_ref)))
    assert err < 3e-2, f"max abs error vs reference: {err}"

    print("KERNEL_OK")
</pallas_src>

<mosaic_0001>
module attributes {stable_mosaic.version = 11 : i64} {
  func.func @pwc_kernel(%arg0: i32, %arg1: i32, %arg2: memref<1x4x16xf32, #tpu.memory_space<vmem>>, %arg3: memref<32x4xf32, #tpu.memory_space<vmem>>, %arg4: memref<32x1xf32, #tpu.memory_space<vmem>>, %arg5: memref<32x16xbf16, #tpu.memory_space<vmem>>, %arg6: memref<1x16xf32, #tpu.memory_space<vmem>>, %arg7: memref<1x32x16xbf16, #tpu.memory_space<vmem>>, %arg8: memref<1x16x16xbf16, #tpu.memory_space<vmem>>) attributes {dimension_semantics = [#tpu.dimension_semantics<parallel>, #tpu.dimension_semantics<parallel>], iteration_bounds = array<i64: 2, 1>, scalar_prefetch = 0 : i64, scratch_operands = 0 : i64, tpu.core_type = #tpu.core_type<tc>, window_params = [{transform_indices = @transform_0, window_bounds = array<i64: 1, 4, 16>}, {pipeline_mode = #tpu.pipeline_mode<synchronous>, transform_indices = @transform_1, window_bounds = array<i64: 32, 4>}, {pipeline_mode = #tpu.pipeline_mode<synchronous>, transform_indices = @transform_2, window_bounds = array<i64: 32, 1>}, {pipeline_mode = #tpu.pipeline_mode<synchronous>, transform_indices = @transform_3, window_bounds = array<i64: 32, 16>}, {pipeline_mode = #tpu.pipeline_mode<synchronous>, transform_indices = @transform_4, window_bounds = array<i64: 1, 16>}, {transform_indices = @transform_5, window_bounds = array<i64: 1, 32, 16>}, {transform_indices = @transform_6, window_bounds = array<i64: 1, 16, 16>}]} {
    %c0 = arith.constant 0 : index
    %c0_0 = arith.constant 0 : index
    %c0_1 = arith.constant 0 : index
    %0 = vector.load %arg2[%c0, %c0_0, %c0_1] : memref<1x4x16xf32, #tpu.memory_space<vmem>>, vector<1x4x16xf32>
    %1 = vector.shape_cast %0 : vector<1x4x16xf32> to vector<4x16xf32>
    %c0_2 = arith.constant 0 : index
    %c0_3 = arith.constant 0 : index
    %2 = vector.load %arg3[%c0_2, %c0_3] : memref<32x4xf32, #tpu.memory_space<vmem>>, vector<32x1xf32>
    %3 = vector.extract_strided_slice %1 {offsets = [0, 0], sizes = [1, 16], strides = [1, 1]} : vector<4x16xf32> to vector<1x16xf32>
    %4 = vector.broadcast %2 : vector<32x1xf32> to vector<32x16xf32>
    %5 = vector.broadcast %3 : vector<1x16xf32> to vector<32x16xf32>
    %6 = arith.mulf %4, %5 : vector<32x16xf32>
    %c0_4 = arith.constant 0 : index
    %c1 = arith.constant 1 : index
    %7 = vector.load %arg3[%c0_4, %c1] : memref<32x4xf32, #tpu.memory_space<vmem>>, vector<32x1xf32>
    %8 = vector.extract_strided_slice %1 {offsets = [1, 0], sizes = [1, 16], strides = [1, 1]} : vector<4x16xf32> to vector<1x16xf32>
    %9 = vector.broadcast %7 : vector<32x1xf32> to vector<32x16xf32>
    %10 = vector.broadcast %8 : vector<1x16xf32> to vector<32x16xf32>
    %11 = arith.mulf %9, %10 : vector<32x16xf32>
    %12 = arith.addf %6, %11 : vector<32x16xf32>
    %c0_5 = arith.constant 0 : index
    %c2 = arith.constant 2 : index
    %13 = vector.load %arg3[%c0_5, %c2] : memref<32x4xf32, #tpu.memory_space<vmem>>, vector<32x1xf32>
    %14 = vector.extract_strided_slice %1 {offsets = [2, 0], sizes = [1, 16], strides = [1, 1]} : vector<4x16xf32> to vector<1x16xf32>
    %15 = vector.broadcast %13 : vector<32x1xf32> to vector<32x16xf32>
    %16 = vector.broadcast %14 : vector<1x16xf32> to vector<32x16xf32>
    %17 = arith.mulf %15, %16 : vector<32x16xf32>
    %18 = arith.addf %12, %17 : vector<32x16xf32>
    %c0_6 = arith.constant 0 : index
    %c3 = arith.constant 3 : index
    %19 = vector.load %arg3[%c0_6, %c3] : memref<32x4xf32, #tpu.memory_space<vmem>>, vector<32x1xf32>
    %20 = vector.extract_strided_slice %1 {offsets = [3, 0], sizes = [1, 16], strides = [1, 1]} : vector<4x16xf32> to vector<1x16xf32>
    %21 = vector.broadcast %19 : vector<32x1xf32> to vector<32x16xf32>
    %22 = vector.broadcast %20 : vector<1x16xf32> to vector<32x16xf32>
    %23 = arith.mulf %21, %22 : vector<32x16xf32>
    %24 = arith.addf %18, %23 : vector<32x16xf32>
    %c0_7 = arith.constant 0 : index
    %c0_8 = arith.constant 0 : index
    %25 = vector.load %arg4[%c0_7, %c0_8] : memref<32x1xf32, #tpu.memory_space<vmem>>, vector<32x1xf32>
    %26 = vector.broadcast %25 : vector<32x1xf32> to vector<32x16xf32>
    %27 = arith.addf %24, %26 : vector<32x16xf32>
    %cst = arith.constant 0.000000e+00 : f32
    %28 = vector.broadcast %cst : f32 to vector<32x16xf32>
    %29 = arith.maximumf %27, %28 : vector<32x16xf32>
    %30 = arith.truncf %29 : vector<32x16xf32> to vector<32x16xbf16>
    %c0_9 = arith.constant 0 : index
    %c0_10 = arith.constant 0 : index
    %c0_11 = arith.constant 0 : index
    %31 = vector.load %arg7[%c0_9, %c0_10, %c0_11] : memref<1x32x16xbf16, #tpu.memory_space<vmem>>, vector<1x32x16xbf16>
    %32 = vector.shape_cast %31 : vector<1x32x16xbf16> to vector<32x16xbf16>
    %33 = vector.shape_cast %30 : vector<32x16xbf16> to vector<1x32x16xbf16>
    tpu.vector_store %arg7[%c0_9, %c0_10, %c0_11], %33 {strides = array<i32>} : memref<1x32x16xbf16, #tpu.memory_space<vmem>>, vector<1x32x16xbf16>,
    %34 = arith.truncf %29 : vector<32x16xf32> to vector<32x16xbf16>
    %c0_12 = arith.constant 0 : index
    %c0_13 = arith.constant 0 : index
    %35 = vector.load %arg5[%c0_12, %c0_13] : memref<32x16xbf16, #tpu.memory_space<vmem>>, vector<32x16xbf16>
    %cst_14 = arith.constant dense<0.000000e+00> : vector<16x16xf32>
    %36 = tpu.matmul %34, %35, %cst_14 {dimension_numbers = #tpu.dot_dimension_numbers<[0], [0], [1], [1], [0, 1, 1, 1], [], []>} : vector<32x16xbf16>, vector<32x16xbf16>, vector<16x16xf32> -> vector<16x16xf32>
    %c0_15 = arith.constant 0 : index
    %c0_16 = arith.constant 0 : index
    %37 = vector.load %arg6[%c0_15, %c0_16] : memref<1x16xf32, #tpu.memory_space<vmem>>, vector<1x16xf32>
    %38 = vector.broadcast %37 : vector<1x16xf32> to vector<16x16xf32>
    %39 = arith.addf %36, %38 : vector<16x16xf32>
    %40 = arith.truncf %39 : vector<16x16xf32> to vector<16x16xbf16>
    %c0_17 = arith.constant 0 : index
    %c0_18 = arith.constant 0 : index
    %c0_19 = arith.constant 0 : index
    %41 = vector.load %arg8[%c0_17, %c0_18, %c0_19] : memref<1x16x16xbf16, #tpu.memory_space<vmem>>, vector<1x16x16xbf16>
    %42 = vector.shape_cast %41 : vector<1x16x16xbf16> to vector<16x16xbf16>
    %43 = vector.shape_cast %40 : vector<16x16xbf16> to vector<1x16x16xbf16>
    tpu.vector_store %arg8[%c0_17, %c0_18, %c0_19], %43 {strides = array<i32>} : memref<1x16x16xbf16, #tpu.memory_space<vmem>>, vector<1x16x16xbf16>,
    return
  }
  func.func @transform_0(%arg0: i32, %arg1: i32) -> (i32, i32, i32) {
    %c0_i32 = arith.constant 0 : i32
    %c0_i32_0 = arith.constant 0 : i32
    return %arg0, %c0_i32, %arg1 : i32, i32, i32
  }
  func.func @transform_1(%arg0: i32, %arg1: i32) -> (i32, i32) {
    %c0_i32 = arith.constant 0 : i32
    %c0_i32_0 = arith.constant 0 : i32
    %c0_i32_1 = arith.constant 0 : i32
    return %c0_i32, %c0_i32_0 : i32, i32
  }
  func.func @transform_2(%arg0: i32, %arg1: i32) -> (i32, i32) {
    %c0_i32 = arith.constant 0 : i32
    %c0_i32_0 = arith.constant 0 : i32
    %c0_i32_1 = arith.constant 0 : i32
    return %c0_i32, %c0_i32_0 : i32, i32
  }
  func.func @transform_3(%arg0: i32, %arg1: i32) -> (i32, i32) {
    %c0_i32 = arith.constant 0 : i32
    %c0_i32_0 = arith.constant 0 : i32
    %c0_i32_1 = arith.constant 0 : i32
    return %c0_i32, %c0_i32_0 : i32, i32
  }
  func.func @transform_4(%arg0: i32, %arg1: i32) -> (i32, i32) {
    %c0_i32 = arith.constant 0 : i32
    %c0_i32_0 = arith.constant 0 : i32
    %c0_i32_1 = arith.constant 0 : i32
    return %c0_i32, %c0_i32_0 : i32, i32
  }
  func.func @transform_5(%arg0: i32, %arg1: i32) -> (i32, i32, i32) {
    %c0_i32 = arith.constant 0 : i32
    %c0_i32_0 = arith.constant 0 : i32
    return %arg0, %c0_i32, %arg1 : i32, i32, i32
  }
  func.func @transform_6(%arg0: i32, %arg1: i32) -> (i32, i32, i32) {
    %c0_i32 = arith.constant 0 : i32
    %c0_i32_0 = arith.constant 0 : i32
    return %arg0, %arg1, %c0_i32 : i32, i32, i32
  }
}

</mosaic_0001>

<bundles_post_ra>
// kernel: tpu_custom_call.1
= control target key start
LH: loop header
LB: loop body
LE: loop exit
PB: predicated region body
PF: predicated region fallthrough
CT: control target
= control target key end

     0   :  { %12 = vsyncpa [#allocation3], 0  ;;  %s1102_s0 = inlined_call_operand.vmem [shape: f32[2,4,16], index: 0, kind: input, shape index: {}]   ;;  %s1103_s1 = inlined_call_operand.vmem [shape: f32[32,4], index: 1, kind: input, shape index: {}]   ;;  %s1104_s2 = inlined_call_operand.vmem [shape: f32[32,1], index: 2, kind: input, shape index: {}]   ;;  %s1105_s3 = inlined_call_operand.vmem [shape: bf16[32,16], index: 3, kind: input, shape index: {}]   ;;  %s1106_s4 = inlined_call_operand.vmem [shape: f32[1,16], index: 4, kind: input, shape index: {}]   ;;  %s1107_s5 = inlined_call_operand.vmem [shape: bf16[2,32,16], index: 5, kind: output, shape index: {0}]   ;;  %s1108_s6 = inlined_call_operand.hbm [shape: bf16[2,16,16], index: 6, kind: output, shape index: {1}]  }
   0x1   :  { %14 = vsyncpa [#allocation3 + $0x1], 0  ;;  %s941_s21 = smov 0   ;;  %s943_s22 = smov 0  }
   0x2   :  { %s945_s23 = smov 0   ;;  %s947_s24 = smov 0  }
   0x3   :  { %s949_s25 = smov 0   ;;  %s951_s26 = smov 0  }
   0x4 LB: > { %s698_s27 = sadd.s32 4294967295, %s895_s26   ;;  %s699_s28 = sadd.s32 4294967294, %s895_s26   ;;  %s895_s26 = sphi %s951_s26, %s20_s26   ;;  %s891_s25 = sphi %s949_s25, %s1115_s25   ;;  %s887_s24 = sphi %s947_s24, %s1114_s24   ;;  %s883_s23 = sphi %s945_s23, %s1113_s23   ;;  %s879_s22 = sphi %s943_s22, %s1112_s22   ;;  %s875_s21 = sphi %s941_s21, %s1111_s21  }
   0x5   : > { %s32_s29 = sadd.s32 1, %s891_s25  ;;  %s181_s30 = sadd.s32 1, %s883_s23 }
   0x6   : > { %p34_p0 = scmp.ge.s32.totalorder %s32_s29, 2  ;;  %p191_p1 = scmp.ne.s32.totalorder %s883_s23, %s879_s22 }
   0x7   : > { %p192_p2 = scmp.eq.s32.totalorder %s698_s27, 1  ;;  %p197_p3 = scmp.ne.s32.totalorder %s879_s22, %s875_s21 }
   0x8   : > { %s1117_s29 = smov (%p34_p0, %s32_s29), 0  ;;  %p198_p5 = scmp.eq.s32.totalorder %s699_s28, 1 }
   0x9   : > { %p981_p4 = por %p192_p2, %p191_p1  ;;  %s176_s8 = ssub.s32 %s891_s25, %s1117_s29 }
   0xa   : > { %p702_p6 = scmp.ge.s32.totalorder %s895_s26, 1  ;;  %p179_p7 = scmp.eq.s32.totalorder %s176_s8, 0 }
   0xb   : > { %p988_p8 = por %p198_p5, %p197_p3  ;;  %p238_p9 = scmp.lt.s32.totalorder %s895_s26, 3 }
   0xc   : > { %s994_s10 = scalar_select %p179_p7, %s883_s23, %s181_s30  }
   0xd   : > { %p239_p10 = pnand %p702_p6, %p238_p9 }
   0xe   : > { %v296_v0 = vld [vmem:[%s1103_s1] sm:$0xff] (!%p239_p10)  ;;  %v897_v1 = vmov (!%p239_p10), 1   ;;  %v898_v2 = vmov (!%p239_p10), 0   ;;  %v297_v3 = vld [vmem:[%s1103_s1 + $0x8] sm:$0xff] (!%p239_p10)  ;;  %v298_v4 = vld [vmem:[%s1103_s1 + $0x10] sm:$0xff] (!%p239_p10)  ;;  %v899_v6 = vmov (!%p239_p10), 2   ;;  %v320_v21 = vlaneseq (!%p239_p10) }
   0xf   : > { %242 = sbr.rel (%p239_p10) target bundleno = 531 (0x213), region = 40  ;;  %805 = vset.pattern.permute.xlu1 (!%p239_p10), %v897_v1  ;;  %804 = vset.pattern.permute.xlu0 (!%p239_p10), %v898_v2  ;;  %v299_v5 = vld [vmem:[%s1103_s1 + $0x18] sm:$0xff] (!%p239_p10)  ;;  %v900_v7 = vmov (!%p239_p10), 3   ;;  %v413_v8 = vld [vmem:[%s1104_s2 + $0x8] sm:$0xff] (!%p239_p10)  ;;  %v412_v9 = vld [vmem:[%s1104_s2] sm:$0xff] (!%p239_p10)  ;;  %v901_v13 = vmov (!%p239_p10), 0.0  }
  0x10   : > { %329 = vperm.xlu1 (!%p239_p10), %805, %v296_v0   ;;  %302 = vperm.xlu0 (!%p239_p10), %804, %v296_v0   ;;  %v414_v10 = vld [vmem:[%s1104_s2 + $0x10] sm:$0xff] (!%p239_p10)  ;;  %v415_v11 = vld [vmem:[%s1104_s2 + $0x18] sm:$0xff] (!%p239_p10)  ;;  %v815_v12 = vld [vmem:[%s1105_s3] sm:$0xff] (!%p239_p10)   ;;  %vm902_vm0 = vmmov (!%p239_p10), 0   ;;  %p278_p11 = scmp.lt.s32.totalorder (!%p239_p10), %s887_s24, 1  ;;  %v321_v24 = vshrl.u32 (!%p239_p10), %v320_v21, 7 }
  0x11   : > { %733 = vmatprep.subr.bf16.mxu0 (!%p239_p10), %v901_v13  ;;  %737 = vmatprep.mubr.msk.bf16.mxu0 (!%p239_p10), %vm902_vm0, %v901_v13  ;;  %v816_v14 = vld [vmem:[%s1105_s3 + $0x8] sm:$0xff] (!%p239_p10)   ;;  %vm460_vm1 = vcmask (!%p239_p10), 125952   ;;  %vm504_vm2 = vcmask (!%p239_p10), 261120   ;;  %s275_s12 = sand.u32 (!%p239_p10), 1, %s879_s22   ;;  %s903_s30 = smov (!%p239_p10), [#allocation2]  }
  0x12   : > { %734 = vmatpush3.bf16.msra.mxu0 (!%p239_p10), %v815_v12  ;;  %v346_v27 = vsub.s32 (!%p239_p10), 1, %v321_v24  ;;  %v322_v28 = vsub.s32 (!%p239_p10), 0, %v321_v24  ;;  %v374_v29 = vsub.s32 (!%p239_p10), 2, %v321_v24  ;;  %v402_v38 = vsub.s32 (!%p239_p10), 3, %v321_v24  ;;  %s703_s13 = sshll.u32 (!%p239_p10), %s275_s12, 3  ;;  %s821_s8 = sshll.u32 (!%p239_p10), %s903_s30, 4  ;;  %s822_s8 = int_to_ptr.vmem [resolvable:$false] %s821_s8 }
  0x13   : > { %735 = vmatprep.subr.bf16.mxu0 (!%p239_p10), %v901_v13  ;;  %s277_s16 = scalar_lea.vmem (!%p239_p10), [#allocation2], %s703_s13 }
  0x14   : > { %333 = vperm.xlu1 (!%p239_p10), %805, %v297_v3   ;;  %307 = vperm.xlu0 (!%p239_p10), %804, %v297_v3  }
  0x16   : > { %736 = vmatpush3.bf16.msra.mxu0 %v816_v14  ;;  %s1028_s17 = scalar_select %p278_p11, %s887_s24, 1 }
  0x18   : > { %806 = vset.pattern.permute.xlu1 %v898_v2  ;;  %312 = vperm.xlu0 %804, %v298_v4   ;;  %s704_s18 = sshll.u32 %s1028_s17, 2  ;;  %s722_s28 = sshll.u32 %s1028_s17, 4 }
  0x19   : > { %317 = vperm.xlu1 %806, %v299_v5   ;;  %s284_s27 = scalar_lea.vmem %s1102_s0, %s704_s18  ;;  %s292_s11 = scalar_lea.vmem %s1107_s5, %s722_s28 }
  0x1a   : > { %v295_v30 = vld [vmem:[%s284_s27] sm:$0xf]  ;;  %s586_s17 = sshll.u32 %s277_s16, 4  ;;  %s729_s18 = sshll.u32 %s887_s24, 7  ;;  %s1047_s17 = int_to_ptr.vmem [resolvable:$true] %s586_s17 }
  0x1b   : > { %v347_v32 = vrot.slane %v295_v30, %v346_v27  ;;  %v323_v33 = vrot.slane %v295_v30, %v322_v28  ;;  %v375_v34 = vrot.slane %v295_v30, %v374_v29  ;;  %v403_v43 = vrot.slane %v295_v30, %v402_v38  ;;  %s1052_s27 = scalar_lea.hbm %s1108_s6, %s729_s18  ;;  %s1056_s24 = scalar_lea.sflag [#allocation3], %s275_s12 }
  0x1c   : > { %807 = vset.pattern.permute.xlu0 %v897_v1  ;;  %s817_s28 = scalar_lea.vmem %s1047_s17, 128  ;;  %p824_p1 = scmp.lt.s32.totalorder %s1047_s17, %s822_s8 }
  0x1d   : > { %808 = vset.pattern.permute.xlu1 %v897_v1  ;;  %337 = vperm.xlu0 %807, %v298_v4   ;;  %p818_p12 = scmp.ne.s32.totalorder %s1047_s17, %s817_s28 }
  0x1e   : > { %341 = vperm.xlu1 %808, %v299_v5  }
  0x1f   : > { %p819_p13 = pnand %p818_p12, %p981_p4 }
  0x21   : > { %810 = vset.pattern.permute.xlu0 %v899_v6  ;;  %p820_p0 = pneg %p819_p13 }
  0x22   : > { %809 = vset.pattern.permute.xlu1 %v899_v6  ;;  %361 = vperm.xlu0 %810, %v297_v3  }
  0x23   : > { %357 = vperm.xlu1 %809, %v296_v0  }
  0x26   : > { %811 = vset.pattern.permute.xlu0 %v900_v7 }
  0x27   : > { %365 = vperm.xlu1 %809, %v298_v4   ;;  %385 = vperm.xlu0 %811, %v296_v0  }
  0x2b   : > { %369 = vperm.xlu1 %809, %v299_v5   ;;  %397 = vperm.xlu0 %811, %v299_v5  }
  0x2f   : > { %812 = vset.pattern.permute.xlu1 %v900_v7  ;;  %814 = vset.pattern.permute.xlu0 %v898_v2 }
  0x30   : > { %389 = vperm.xlu1 %812, %v297_v3   ;;  %423 = vperm.xlu0 %814, %v413_v8  }
  0x34   : > { %393 = vperm.xlu1 %812, %v298_v4  }
  0x38   : > { %813 = vset.pattern.permute.xlu1 %v898_v2 }
  0x39   : > { %418 = vperm.xlu1 %813, %v412_v9  }
  0x3d   : > { %428 = vperm.xlu1 %813, %v414_v10  }
  0x41   : > { %433 = vperm.xlu1 %813, %v415_v11  }
  0x8f   : > { %v330_v15 = vpop.permute.xlu1 %329  ;;  %v303_v16 = vpop.permute.xlu0 %302 }
  0x90   : > { %v348_v44 = vmul.f32 %v347_v32, %v330_v15  ;;  %v324_v45 = vmul.f32 %v323_v33, %v303_v16 }
  0x92   : > { %v352_v52 = vadd.f32 %v348_v44, %v324_v45 }
  0x93   : > { %v334_v17 = vpop.permute.xlu1 %333  ;;  %v308_v18 = vpop.permute.xlu0 %307 }
  0x94   : > { %v349_v36 = vmul.f32 %v347_v32, %v334_v17  ;;  %v325_v37 = vmul.f32 %v323_v33, %v308_v18 }
  0x96   : > { %v353_v42 = vadd.f32 %v349_v36, %v325_v37 }
  0x97   : > { %v313_v19 = vpop.permute.xlu0 %312 }
  0x98   : > { %v318_v20 = vpop.permute.xlu1 %317  ;;  %v326_v53 = vmul.f32 %v323_v33, %v313_v19 }
  0x99   : > { %v327_v61 = vmul.f32 %v323_v33, %v318_v20 }
  0x9c   : > { %v338_v22 = vpop.permute.xlu0 %337 }
  0x9d   : > { %v342_v23 = vpop.permute.xlu1 %341  ;;  %v350_v54 = vmul.f32 %v347_v32, %v338_v22 }
  0x9e   : > { %v351_v58 = vmul.f32 %v347_v32, %v342_v23 }
  0x9f   : > { %v354_v63 = vadd.f32 %v350_v54, %v326_v53 }
  0xa0   : > { %v355_v5 = vadd.f32 %v351_v58, %v327_v61 }
  0xa1   : > { %v362_v26 = vpop.permute.xlu0 %361 }
  0xa2   : > { %v358_v25 = vpop.permute.xlu1 %357  ;;  %v377_v40 = vmul.f32 %v375_v34, %v362_v26 }
  0xa3   : > { %v376_v49 = vmul.f32 %v375_v34, %v358_v25  ;;  %v711_v25 = vld [vmem:[%s1106_s4] ss:$0 sm:$0xff] }
  0xa4   : > { %v381_v47 = vadd.f32 %v377_v40, %v353_v42 }
  0xa5   : > { %v380_v59 = vadd.f32 %v376_v49, %v352_v52 }
  0xa6   : > { %v366_v31 = vpop.permute.xlu1 %365  ;;  %v386_v35 = vpop.permute.xlu0 %385 }
  0xa7   : > { %v404_v55 = vmul.f32 %v403_v43, %v386_v35  ;;  %v378_v60 = vmul.f32 %v375_v34, %v366_v31 }
  0xa9   : > { %v408_v2 = vadd.f32 %v404_v55, %v380_v59  ;;  %v382_v6 = vadd.f32 %v378_v60, %v354_v63 }
  0xaa   : > { %v370_v39 = vpop.permute.xlu1 %369  ;;  %v398_v41 = vpop.permute.xlu0 %397 }
  0xab   : > { %v379_v0 = vmul.f32 %v375_v34, %v370_v39  ;;  %v407_v9 = vmul.f32 %v403_v43, %v398_v41 }
  0xad   : > { %v383_v8 = vadd.f32 %v379_v0, %v355_v5 }
  0xaf   : > { %v390_v46 = vpop.permute.xlu1 %389  ;;  %v424_v50 = vpop.permute.xlu0 %423  ;;  %v411_v17 = vadd.f32 %v407_v9, %v383_v8 }
  0xb0   : > { %v405_v48 = vmul.f32 %v403_v43, %v390_v46 }
  0xb2   : > { %v409_v51 = vadd.f32 %v405_v48, %v381_v47 }
  0xb3   : > { %v394_v56 = vpop.permute.xlu1 %393 }
  0xb4   : > { %v437_v57 = vadd.f32 %v424_v50, %v409_v51  ;;  %v406_v1 = vmul.f32 %v403_v43, %v394_v56 }
  0xb6   : > { %v441_v62 = vmax.f32 %v437_v57, 0.0  ;;  %v410_v11 = vadd.f32 %v406_v1, %v382_v6 }
  0xb8   : > { %v724_v3 = vpack.c.bf16 %v441_v62, %v441_v62  ;;  %v419_v4 = vpop.permute.xlu1 %418 }
  0xb9   : > { %v436_v7 = vadd.f32 %v419_v4, %v408_v2 }
  0xba   : > { %462 = vst.msk [vmem:[%s292_s11 + $0x4] sm:$0xf] %vm460_vm1, %v724_v3 }
  0xbb   : > { %v440_v10 = vmax.f32 %v436_v7, 0.0 }
  0xbc   : > { %v429_v12 = vpop.permute.xlu1 %428 }
  0xbd   : > { %v444_v13 = vpack.c.bf16 %v441_v62, %v440_v10  ;;  %v723_v14 = vpack.c.bf16 %v440_v10, %v440_v10  ;;  %v438_v15 = vadd.f32 %v429_v12, %v410_v11 }
  0xbf   : > { %461 = vst.msk [vmem:[%s292_s11] sm:$0xf] %vm460_vm1, %v723_v14  ;;  %v442_v16 = vmax.f32 %v438_v15, 0.0  ;;  %476 = vxpose.xlu0.c.b16.start [1/2] (short) (narrow) %v444_v13, 16 }
  0xc0   : > { %v434_v18 = vpop.permute.xlu1 %433 }
  0xc1   : > { %v725_v19 = vpack.c.bf16 %v442_v16, %v442_v16  ;;  %v439_v20 = vadd.f32 %v434_v18, %v411_v17 }
  0xc3   : > { %463 = vst.msk [vmem:[%s292_s11 + $0x8] sm:$0xf] %vm460_vm1, %v725_v19  ;;  %v443_v21 = vmax.f32 %v439_v20, 0.0 }
  0xc5   : > { %v445_v22 = vpack.c.bf16 %v443_v21, %v442_v16  ;;  %v726_v23 = vpack.c.bf16 %v443_v21, %v443_v21 }
  0xc7   : > { %464 = vst.msk [vmem:[%s292_s11 + $0xc] sm:$0xf] %vm460_vm1, %v726_v23  ;;  %477 = vxpose.xlu0.c.b16.end [2/2] (short) (narrow) %v445_v22, 16  ;;  %s823_s11 = scalar_lea.vmem %s822_s8, 256 }
  0xc8   : > { %p825_p2 = scmp.lt.s32.totalorder %s823_s11, %s817_s28 }
  0xca   : > { %p826_p3 = por %p825_p2, %p824_p1 }
  0xcc   : > { %p827_p5 = pnand %p826_p3, %p820_p0 }
 0x129   : > { %v484_v24 = vpop.trf.xlu0 }
 0x12a   : > { %738 = vmatmul.mubr.msk.bf16.vlgmr.msra.gmra.mrb[0].mxu0 %vm504_vm2, %v484_v24 }
 0x1fd   : > { %v542_v26 = vpop.f32.mrb[0].mxu0 }
 0x1fe   : > { %v543_v27 = vadd.f32 %v711_v25, %v542_v26  ;;  %v739_v28 = vpop.f32.mrb[1].mxu0 }
 0x1ff   : > { %v545_v29 = vpop.f32.mrb[2].mxu0 }
 0x200   : > { %v727_v30 = vpack.c.bf16 %v543_v27, %v543_v27  ;;  %v546_v31 = vadd.f32 %v711_v25, %v545_v29  ;;  %v740_v32 = vpop.f32.mrb[3].mxu0 }
 0x202   : > { %557 = vst.msk [vmem:[%s277_s16] sm:$0xf] %vm460_vm1, %v727_v30  ;;  %v728_v33 = vpack.c.bf16 %v546_v31, %v546_v31 }
 0x204   : > { %558 = vst.msk [vmem:[%s277_s16 + $0x4] sm:$0xf] %vm460_vm1, %v728_v33 }
 0x205   : > { %830 = shalt.err (!%p827_p5)
}
 0x206   : > { %s831_s12 = scalar_lea.hbm %s1052_s27, 128  ;;  %s835_s15 = scalar_lea.hbm %s1108_s6, 256 }
 0x207   : > { %p832_p6 = scmp.ne.s32.totalorder %s1052_s27, %s831_s12  ;;  %p836_p10 = scmp.lt.u32.totalorder %s1052_s27, %s1108_s6 }
 0x208   : > { %p837_p11 = scmp.lt.u32.totalorder %s835_s15, %s831_s12  ;;  %p839_p13 = scmp.lt.u32.totalorder %s831_s12, %s1052_s27 }
 0x209   : > { %p833_p7 = pnand %p832_p6, %p981_p4 }
 0x20a   : > { %p838_p12 = por %p837_p11, %p836_p10 }
 0x20b   : > { %p834_p9 = pneg %p833_p7 }
 0x20c   : > { %p840_p0 = por %p839_p13, %p838_p12 }
 0x20e   : > { %p841_p1 = pnand %p840_p0, %p834_p9 }
 0x210   : > { %844 = shalt.err (!%p841_p1)
}
 0x211   : > { %s904_s19 = smov 64   ;;  %s905_s20 = smov 4  }
 0x212   : > { %741 = dma.vmem_to_hbm [thread:$0]  (%p981_p4), %s1047_s17, 128, %s1052_s27, %s1056_s24, %s904_s19, %s904_s19, %s905_s20  }
 0x213 PF: > { %p747_p2 = scmp.ge.s32.totalorder %s895_s26, 2  ;;  %s612_s28 = sand.u32 1, %s875_s21  }
 0x214   : > { %s613_s30 = scalar_lea.sflag [#allocation3], %s612_s28 }
 0x215   : > { %p744_p3 = pnand %p747_p2, %p988_p8 }
 0x217   : > { %870 = dma.done.wait (!%p744_p3), %s613_s30, 128  }
 0x218   : > { %872 = vsyncadd (!%p744_p3), %s613_s30, 4294967168  ;;  %s20_s26 = sadd.s32 1, %s895_s26   ;;  %s1111_s21 = smov %s879_s22 }
 0x219   : > { %p17_p5 = scmp.ge.s32.totalorder %s20_s26, 4   ;;  %s1112_s22 = smov %s883_s23 }
 0x21a   : > { %s1113_s23 = smov %s994_s10  ;;  %s1114_s24 = smov %s891_s25 }
 0x21b   : > { %s1115_s25 = smov %s1117_s29  ;;  %19 = sbr.rel (!%p17_p5) target bundleno = 4 (0x4), region = 87 }
 0x222   :  { %618 = vsyncpa [#allocation3], 1 }
 0x223   :  { %620 = vsyncpa [#allocation3 + $0x1], 1 }

</bundles_post_ra>
